<compile_context>
chip_gen: v7x
topology: tpu7x:2x2x1
jax: 0.10.0
libtpu: 0.0.40
codegen_flags: <defaults>
</compile_context>

<pallas_src>
import jax
import jax.numpy as jnp
import numpy as np
from jax.experimental import pallas as pl
from jax.experimental.pallas import tpu as pltpu


def _round_up(x, m):
    return ((x + m - 1) // m) * m


# ---------------------------------------------------------------------------
# Pass 1: tiled max / first-argmax over the anchor axis (the HBM-bound part).
# ---------------------------------------------------------------------------
def _argmax_kernel(cls_ref, score_ref, idx_ref):
    t = pl.program_id(0)

    @pl.when(t == 0)
    def _init():
        score_ref[...] = jnp.full(score_ref.shape, -jnp.inf, dtype=score_ref.dtype)
        idx_ref[...] = jnp.zeros(idx_ref.shape, dtype=idx_ref.dtype)

    tile = cls_ref[...].astype(jnp.float32)                     # (B, TN)
    b, tn = tile.shape

    tile_max = jnp.max(tile, axis=1, keepdims=True)             # (B, 1)
    lane = jax.lax.broadcasted_iota(jnp.int32, (b, tn), 1)
    # first in-tile index achieving the max (matches torch/jnp argmax ties)
    in_tile_idx = jnp.min(jnp.where(tile == tile_max, lane, tn),
                          axis=1, keepdims=True)                # (B, 1) int32
    global_idx = in_tile_idx + t * tn                           # (B, 1) int32

    # strictly-greater keeps the earliest tile on ties -> global first index
    better = tile_max > score_ref[...]
    score_ref[...] = jnp.where(better, tile_max, score_ref[...])
    idx_ref[...] = jnp.where(better, global_idx, idx_ref[...])


# ---------------------------------------------------------------------------
# Pass 2: gather only the selected regression/anchor rows + box decode.
# ---------------------------------------------------------------------------
def _make_decode_kernel(img_size, rows_per_block):
    x_hi = float(img_size[0] - 1)
    y_hi = float(img_size[1] - 1)
    z_hi = float(img_size[2] - 1)
    rb = rows_per_block

    def kernel(idx_ref, reg_ref, anc_ref, box_ref):
        # idx_ref : SMEM (B,) int32 scalar-prefetch (also consumed by index_maps)
        # reg_ref : VMEM (rb, 6) block containing the selected regression row
        # anc_ref : VMEM (rb, 6) block containing the selected anchor row
        # box_ref : VMEM (1, 6) output block for this batch element
        b = pl.program_id(0)
        r = idx_ref[b] % rb                                     # row inside block

        reg = reg_ref[pl.ds(r, 1), :].astype(jnp.float32)       # (1, 6)
        anc = anc_ref[pl.ds(r, 1), :].astype(jnp.float32)       # (1, 6)

        centers = reg[:, 0:3] * anc[:, 3:6] + anc[:, 0:3]       # (1, 3)
        sizes = jnp.exp(reg[:, 3:6]) * anc[:, 3:6]              # (1, 3)

        mins = jnp.maximum(centers - 0.5 * sizes, 0.0)
        lane3 = jax.lax.broadcasted_iota(jnp.int32, (1, 3), 1)
        hi = jnp.where(lane3 == 0, x_hi,
                       jnp.where(lane3 == 1, y_hi, z_hi)).astype(jnp.float32)
        maxs = jnp.minimum(centers + 0.5 * sizes, hi)

        box_ref[...] = jnp.concatenate([mins, maxs], axis=-1)   # (1, 6)

    return kernel


def sdecoder_forward(cls_heads, reg_heads, batch_anchors, img_size, *, tile_n=2048):
    """Pallas equivalent of SDecoder(img_size).forward(...).

    Returns (max_scores (B,), pred_bboxes (B, 6))."""
    B, N = cls_heads.shape

    # ---- pass 1: tiled max/argmax over anchors ----------------------------
    tn = min(tile_n, _round_up(N, 128))
    n_pad = _round_up(N, tn)
    cls = cls_heads
    if n_pad != N:
        # pad with -inf so padded lanes can never win the max/argmax
        cls = jnp.pad(cls, ((0, 0), (0, n_pad - N)), constant_values=-jnp.inf)
    num_tiles = n_pad // tn

    scores2d, idx2d = pl.pallas_call(
        _argmax_kernel,
        grid=(num_tiles,),
        in_specs=[pl.BlockSpec((B, tn), lambda t: (0, t))],
        out_specs=(pl.BlockSpec((B, 1), lambda t: (0, 0)),
                   pl.BlockSpec((B, 1), lambda t: (0, 0))),
        out_shape=(jax.ShapeDtypeStruct((B, 1), jnp.float32),
                   jax.ShapeDtypeStruct((B, 1), jnp.int32)),
        compiler_params=pltpu.CompilerParams(
            dimension_semantics=("arbitrary",)),
    )(cls)

    # ---- pass 2: data-dependent row gather + decode ------------------------
    rb = min(8, N)                         # sublane-aligned gather granularity
    idx_flat = idx2d.reshape(B)
    decode_kernel = _make_decode_kernel(img_size, rb)

    boxes3d = pl.pallas_call(
        decode_kernel,
        grid_spec=pltpu.PrefetchScalarGridSpec(
            num_scalar_prefetch=1,
            grid=(B,),
            in_specs=[
                # rb-row neighbourhood of the selected regression row of batch b
                pl.BlockSpec((None, rb, 6), lambda b, idx: (b, idx[b] // rb, 0)),
                # rb-row neighbourhood of the selected anchor row
                pl.BlockSpec((rb, 6), lambda b, idx: (idx[b] // rb, 0)),
            ],
            out_specs=pl.BlockSpec((None, 1, 6), lambda b, idx: (b, 0, 0)),
        ),
        out_shape=jax.ShapeDtypeStruct((B, 1, 6), jnp.float32),
        compiler_params=pltpu.CompilerParams(
            dimension_semantics=("parallel",)),
    )(idx_flat, reg_heads, batch_anchors)

    return scores2d[:, 0], boxes3d.reshape(B, 6)


def sdecoder_reference(cls_heads, reg_heads, batch_anchors, img_size):
    """Pure-JAX reference matching the PyTorch forward."""
    B = cls_heads.shape[0]
    scores = jnp.max(cls_heads, axis=1)
    idx = jnp.argmax(cls_heads, axis=1)
    reg = reg_heads[jnp.arange(B), idx]          # (B, 6)
    anc = batch_anchors[idx]                     # (B, 6)
    cx = reg[:, 0] * anc[:, 3] + anc[:, 0]
    cy = reg[:, 1] * anc[:, 4] + anc[:, 1]
    cz = reg[:, 2] * anc[:, 5] + anc[:, 2]
    w = jnp.exp(reg[:, 3]) * anc[:, 3]
    h = jnp.exp(reg[:, 4]) * anc[:, 4]
    d = jnp.exp(reg[:, 5]) * anc[:, 5]
    x1 = jnp.maximum(cx - w / 2, 0.0)
    y1 = jnp.maximum(cy - h / 2, 0.0)
    z1 = jnp.maximum(cz - d / 2, 0.0)
    x2 = jnp.minimum(cx + w / 2, img_size[0] - 1)
    y2 = jnp.minimum(cy + h / 2, img_size[1] - 1)
    z2 = jnp.minimum(cz + d / 2, img_size[2] - 1)
    return scores, jnp.stack([x1, y1, z1, x2, y2, z2], axis=-1)


if __name__ == "__main__":
    img_size = (96, 96, 96)
    B, N = 2, 4096   # N spans 2 tiles of 2048 -> exercises the running argmax

    key = jax.random.PRNGKey(0)
    k1, k2, k3, k4 = jax.random.split(key, 4)
    cls_heads = jax.random.normal(k1, (B, N), dtype=jnp.float32)
    reg_heads = 0.1 * jax.random.normal(k2, (B, N, 6), dtype=jnp.float32)
    anchor_centers = jax.random.uniform(k3, (N, 3), minval=0.0, maxval=95.0,
                                        dtype=jnp.float32)
    anchor_sizes = jax.random.uniform(k4, (N, 3), minval=4.0, maxval=24.0,
                                      dtype=jnp.float32)
    batch_anchors = jnp.concatenate([anchor_centers, anchor_sizes], axis=-1)  # (N, 6)

    scores, boxes = sdecoder_forward(cls_heads, reg_heads, batch_anchors, img_size)
    jax.block_until_ready((scores, boxes))

    ref_scores, ref_boxes = sdecoder_reference(cls_heads, reg_heads,
                                               batch_anchors, img_size)
    np.testing.assert_allclose(np.asarray(scores), np.asarray(ref_scores),
                               rtol=1e-5, atol=1e-5)
    np.testing.assert_allclose(np.asarray(boxes), np.asarray(ref_boxes),
                               rtol=1e-5, atol=1e-4)

    print("KERNEL_OK")
</pallas_src>

<mosaic_0001>
module attributes {stable_mosaic.version = 11 : i64} {
  func.func @_argmax_kernel(%arg0: i32, %arg1: memref<2x2048xf32, #tpu.memory_space<vmem>>, %arg2: memref<2x1xf32, #tpu.memory_space<vmem>>, %arg3: memref<2x1xi32, #tpu.memory_space<vmem>>) attributes {dimension_semantics = [#tpu.dimension_semantics<arbitrary>], iteration_bounds = array<i64: 2>, scalar_prefetch = 0 : i64, scratch_operands = 0 : i64, tpu.core_type = #tpu.core_type<tc>, window_params = [{transform_indices = @transform_0, window_bounds = array<i64: 2, 2048>}, {pipeline_mode = #tpu.pipeline_mode<synchronous>, transform_indices = @transform_1, window_bounds = array<i64: 2, 1>}, {pipeline_mode = #tpu.pipeline_mode<synchronous>, transform_indices = @transform_2, window_bounds = array<i64: 2, 1>}]} {
    %c0_i32 = arith.constant 0 : i32
    %0 = arith.cmpi eq, %arg0, %c0_i32 : i32
    %1 = arith.extui %0 : i1 to i32
    %c0_i32_0 = arith.constant 0 : i32
    %2 = arith.cmpi ne, %1, %c0_i32_0 : i32
    scf.if %2 {
      %cst_14 = arith.constant 0xFF800000 : f32
      %24 = vector.broadcast %cst_14 : f32 to vector<2x1xf32>
      %c0_15 = arith.constant 0 : index
      %c0_16 = arith.constant 0 : index
      %25 = vector.load %arg2[%c0_15, %c0_16] : memref<2x1xf32, #tpu.memory_space<vmem>>, vector<2x1xf32>
      tpu.vector_store %arg2[%c0_15, %c0_16], %24 {strides = array<i32>} : memref<2x1xf32, #tpu.memory_space<vmem>>, vector<2x1xf32>,
      %c0_i32_17 = arith.constant 0 : i32
      %26 = vector.broadcast %c0_i32_17 : i32 to vector<2x1xi32>
      %c0_18 = arith.constant 0 : index
      %c0_19 = arith.constant 0 : index
      %27 = vector.load %arg3[%c0_18, %c0_19] : memref<2x1xi32, #tpu.memory_space<vmem>>, vector<2x1xi32>
      tpu.vector_store %arg3[%c0_18, %c0_19], %26 {strides = array<i32>} : memref<2x1xi32, #tpu.memory_space<vmem>>, vector<2x1xi32>,
    } else {
    }
    %c0 = arith.constant 0 : index
    %c0_1 = arith.constant 0 : index
    %3 = vector.load %arg1[%c0, %c0_1] : memref<2x2048xf32, #tpu.memory_space<vmem>>, vector<2x2048xf32>
    %cst = arith.constant dense<0xFF800000> : vector<2xf32>
    %4 = vector.multi_reduction <maximumf>, %3, %cst [1] : vector<2x2048xf32> to vector<2xf32>
    %5 = vector.shape_cast %4 : vector<2xf32> to vector<2x1xf32>
    %6 = tpu.iota {dimensions = array<i32: 1>} : vector<2x2048xi32>
    %7 = vector.broadcast %5 : vector<2x1xf32> to vector<2x2048xf32>
    %8 = arith.cmpf oeq, %3, %7 : vector<2x2048xf32>
    %c2048_i32 = arith.constant 2048 : i32
    %9 = vector.broadcast %c2048_i32 : i32 to vector<2x2048xi32>
    %10 = arith.select %8, %6, %9 : vector<2x2048xi1>, vector<2x2048xi32>
    %cst_2 = arith.constant dense<2147483647> : vector<2xi32>
    %11 = vector.multi_reduction <minsi>, %10, %cst_2 [1] : vector<2x2048xi32> to vector<2xi32>
    %12 = vector.shape_cast %11 : vector<2xi32> to vector<2x1xi32>
    %c2048_i32_3 = arith.constant 2048 : i32
    %13 = arith.muli %arg0, %c2048_i32_3 : i32
    %14 = vector.broadcast %13 : i32 to vector<2x1xi32>
    %15 = arith.addi %12, %14 : vector<2x1xi32>
    %c0_4 = arith.constant 0 : index
    %c0_5 = arith.constant 0 : index
    %16 = vector.load %arg2[%c0_4, %c0_5] : memref<2x1xf32, #tpu.memory_space<vmem>>, vector<2x1xf32>
    %17 = arith.cmpf ogt, %5, %16 : vector<2x1xf32>
    %c0_6 = arith.constant 0 : index
    %c0_7 = arith.constant 0 : index
    %18 = vector.load %arg2[%c0_6, %c0_7] : memref<2x1xf32, #tpu.memory_space<vmem>>, vector<2x1xf32>
    %19 = arith.select %17, %5, %18 : vector<2x1xi1>, vector<2x1xf32>
    %c0_8 = arith.constant 0 : index
    %c0_9 = arith.constant 0 : index
    %20 = vector.load %arg2[%c0_8, %c0_9] : memref<2x1xf32, #tpu.memory_space<vmem>>, vector<2x1xf32>
    tpu.vector_store %arg2[%c0_8, %c0_9], %19 {strides = array<i32>} : memref<2x1xf32, #tpu.memory_space<vmem>>, vector<2x1xf32>,
    %c0_10 = arith.constant 0 : index
    %c0_11 = arith.constant 0 : index
    %21 = vector.load %arg3[%c0_10, %c0_11] : memref<2x1xi32, #tpu.memory_space<vmem>>, vector<2x1xi32>
    %22 = arith.select %17, %15, %21 : vector<2x1xi1>, vector<2x1xi32>
    %c0_12 = arith.constant 0 : index
    %c0_13 = arith.constant 0 : index
    %23 = vector.load %arg3[%c0_12, %c0_13] : memref<2x1xi32, #tpu.memory_space<vmem>>, vector<2x1xi32>
    tpu.vector_store %arg3[%c0_12, %c0_13], %22 {strides = array<i32>} : memref<2x1xi32, #tpu.memory_space<vmem>>, vector<2x1xi32>,
    return
  }
  func.func @transform_0(%arg0: i32) -> (i32, i32) {
    %c0_i32 = arith.constant 0 : i32
    %c0_i32_0 = arith.constant 0 : i32
    return %c0_i32, %arg0 : i32, i32
  }
  func.func @transform_1(%arg0: i32) -> (i32, i32) {
    %c0_i32 = arith.constant 0 : i32
    %c0_i32_0 = arith.constant 0 : i32
    %c0_i32_1 = arith.constant 0 : i32
    return %c0_i32, %c0_i32_0 : i32, i32
  }
  func.func @transform_2(%arg0: i32) -> (i32, i32) {
    %c0_i32 = arith.constant 0 : i32
    %c0_i32_0 = arith.constant 0 : i32
    %c0_i32_1 = arith.constant 0 : i32
    return %c0_i32, %c0_i32_0 : i32, i32
  }
}

</mosaic_0001>

<bundles_post_ra>
// kernel: tpu_custom_call.1
= control target key start
LH: loop header
LB: loop body
LE: loop exit
PB: predicated region body
PF: predicated region fallthrough
CT: control target
= control target key end

     0   :  { %8 = vsyncpa [#allocation3], 0  ;;  %s936_s0 = inlined_call_operand.hbm [shape: f32[2,4096], index: 0, kind: input, shape index: {}]   ;;  %s937_s1 = inlined_call_operand.vmem [shape: f32[2,1], index: 1, kind: output, shape index: {0}]   ;;  %s938_s2 = inlined_call_operand.vmem [shape: s32[2,1], index: 2, kind: output, shape index: {1}]  }
   0x1   :  { %10 = vsyncpa [#allocation3 + $0x1], 0  ;;  %s711_s9 = smov 0   ;;  %s713_s10 = smov 0  }
   0x2   :  { %s715_s11 = smov 0   ;;  %s717_s12 = smov 0  }
   0x3 LB: > { %s730_s13 = sadd.s32 4294967295, %s689_s12   ;;  %s733_s14 = sadd.s32 1, %s689_s12   ;;  %s689_s12 = sphi %s717_s12, %s946_s12   ;;  %s685_s11 = sphi %s715_s11, %s945_s11   ;;  %s681_s10 = sphi %s713_s10, %s944_s10   ;;  %s677_s9 = sphi %s711_s9, %s943_s9  }
   0x4   : > { %s20_s15 = ssub.s32 %s689_s12, %s733_s14  ;;  %s23_s16 = sadd.s32 1, %s685_s11 }
   0x5   : > { %p21_p0 = scmp.eq.s32.totalorder %s20_s15, 0  ;;  %p30_p1 = scmp.ne.s32.totalorder %s685_s11, %s681_s10 }
   0x6   : > { %p31_p2 = scmp.eq.s32.totalorder %s689_s12, 0  ;;  %p36_p3 = scmp.ne.s32.totalorder %s681_s10, %s677_s9 }
   0x7   : > { %s743_s17 = scalar_select %p21_p0, %s685_s11, %s23_s16  }
   0x8   : > { %p32_p4 = por %p31_p2, %p30_p1  ;;  %p37_p5 = scmp.eq.s32.totalorder %s730_s13, 0 }
   0x9   : > { %p584_p6 = scmp.lt.s32.totalorder %s689_s12, 2  ;;  %s102_s19 = sand.u32 1, %s685_s11  }
   0xa   : > { %p747_p7 = por %p37_p5, %p36_p3  ;;  %s568_s20 = sshll.u32 %s102_s19, 5 }
   0xb   : > { %s577_s21 = sshll.u32 %s689_s12, 9  ;;  %s106_s25 = scalar_lea.vmem [#allocation2], %s568_s20 }
   0xc   : > { %s756_s24 = scalar_lea.hbm %s936_s0, %s577_s21  ;;  %s114_s26 = sshll.u32 %s106_s25, 4  ;;  %s758_s26 = int_to_ptr.vmem [resolvable:$true] %s114_s26 }
   0xd   : > { %p760_p8 = pnand %p584_p6, %p32_p4  ;;  %s103_s28 = scalar_lea.sflag [#allocation3], %s102_s19 }
   0xe   : > { %s625_s29 = scalar_lea.hbm %s756_s24, 512  ;;  %s630_s4 = scalar_lea.hbm %s936_s0, 1024 }
   0xf   : > { %p626_p11 = scmp.ne.s32.totalorder %s756_s24, %s625_s29  ;;  %p627_p12 = pneg %p760_p8 }
  0x10   : > { %p631_p1 = scmp.lt.u32.totalorder %s756_s24, %s936_s0  ;;  %p632_p2 = scmp.lt.u32.totalorder %s630_s4, %s625_s29 }
  0x11   : > { %p628_p13 = pnand %p627_p12, %p626_p11  ;;  %p634_p4 = scmp.lt.u32.totalorder %s625_s29, %s756_s24 }
  0x12   : > { %p633_p3 = por %p632_p2, %p631_p1 }
  0x13   : > { %p629_p0 = pneg %p628_p13 }
  0x14   : > { %p635_p5 = por %p634_p4, %p633_p3 }
  0x16   : > { %p636_p6 = pnand %p635_p5, %p629_p0 }
  0x18   : > { %639 = shalt.err (!%p636_p6)
}
  0x19   : > { %s640_s7 = scalar_lea.vmem %s758_s26, 512  ;;  %s691_s8 = smov [#allocation2]  }
  0x1a   : > { %p641_p11 = scmp.ne.s32.totalorder %s758_s26, %s640_s7  ;;  %s645_s9 = sshll.u32 %s691_s8, 4  ;;  %s646_s9 = int_to_ptr.vmem [resolvable:$false] %s645_s9 }
  0x1b   : > { %s647_s15 = scalar_lea.vmem %s646_s9, 1024  ;;  %p648_p10 = scmp.lt.s32.totalorder %s758_s26, %s646_s9 }
  0x1c   : > { %p643_p13 = pnand %p641_p11, %p627_p12  ;;  %p649_p1 = scmp.lt.s32.totalorder %s647_s15, %s640_s7 }
  0x1e   : > { %p644_p9 = pneg %p643_p13  ;;  %p650_p2 = por %p649_p1, %p648_p10 }
  0x20   : > { %p651_p3 = pnand %p650_p2, %p644_p9 }
  0x22   : > { %654 = shalt.err (!%p651_p3)
}
  0x23   : > { %583 = dma.hbm_to_vmem [thread:$0]  (!%p760_p8), %s756_s24, 512, %s758_s26, %s103_s28  }
  0x24   : > { %p941_p0 = scmp.lt.s32.totalorder %s689_s12, 3  ;;  %p942_p4 = scmp.ge.s32.totalorder %s689_s12, 1 }
  0x26   : > { %p120_p12 = pnand %p942_p4, %p941_p0 }
  0x27   : > { %s125_s16 = sand.u32 (!%p120_p12), 1, %s681_s10  }
  0x28   : > { %123 = sbr.rel (%p120_p12) target bundleno = 544 (0x220), region = 24  ;;  %s572_s19 = sshll.u32 (!%p120_p12), %s125_s16, 5 }
  0x29   : > { %s126_s20 = scalar_lea.sflag (!%p120_p12), [#allocation3], %s125_s16  ;;  %s129_s21 = scalar_lea.vmem (!%p120_p12), [#allocation2], %s572_s19 }
  0x2f   : > { %672 = dma.done.wait (%p747_p7), %s126_s20, 512  }
  0x30   : > { %674 = vsyncadd (%p747_p7), %s126_s20, 4294966784  ;;  %p573_p9 = scmp.ne.s32.totalorder %s730_s13, 0 }
  0x31   : > { %vm150_vm0 = vcmask (!%p573_p9), 1024   ;;  %v692_v0 = vmov (!%p573_p9), -inf   ;;  %v693_v1 = vmov (!%p573_p9), 0  }
  0x32   : > { %149 = sbr.rel (%p573_p9) target bundleno = 57 (0x39), region = 32  ;;  %151 = vst.msk [vmem:[%s937_s1] sm:$0x3] (!%p573_p9), %vm150_vm0, %v692_v0  ;;  %152 = vst.msk [vmem:[%s938_s2] sm:$0x3] (!%p573_p9), %vm150_vm0, %v693_v1 }
  0x39 PF: > { %v807_v2 = vld [vmem:[%s129_s21] sm:$0xff]  ;;  %v809_v3 = vld [vmem:[%s129_s21 + $0x8] sm:$0xff]  ;;  %v165_v4 = vlaneseq  ;;  %v811_v5 = vld [vmem:[%s129_s21 + $0x10] sm:$0xff]  ;;  %v694_v7 = vmov 1983009808   ;;  %vm245_vm1 = vcmask 1041408  }
  0x3a   : > { %v813_v6 = vld [vmem:[%s129_s21 + $0x18] sm:$0xff]  ;;  %v163_v8 = vunpack.c.l.s4 %v694_v7  ;;  %v161_v10 = vcombine.high %v807_v2, %v807_v2  ;;  %v178_v12 = vcombine.high %v809_v3, %v809_v3  ;;  %v195_v13 = vcombine.high %v811_v5, %v811_v5  ;;  %s574_s28 = sshll.u32 %s730_s13, 11 }
  0x3b   : > { %v815_v9 = vshrl.u32 %v165_v4, 7  ;;  %v212_v14 = vcombine.high %v813_v6, %v813_v6  ;;  %v280_v63 = vand.u32 127, %v165_v4  ;;  %vm515_vm2 = vcmask 1024  }
  0x3c   : > { %v164_v11 = vunpack.c.0.s8 %v163_v8 }
  0x3d   : > { %v281_v0 = vadd.s32 128, %v280_v63  ;;  %v282_v1 = vadd.s32 256, %v280_v63  ;;  %v283_v7 = vadd.s32 384, %v280_v63  ;;  %v284_v8 = vadd.s32 512, %v280_v63 }
  0x3e   : > { %v826_v15 = vsub.s32 %v164_v11, %v815_v9  ;;  %v286_v11 = vadd.s32 768, %v280_v63 }
  0x40   : > { %v168_v16 = vrot.slane %v807_v2, %v826_v15  ;;  %v175_v17 = vrot.slane %v161_v10, %v826_v15  ;;  %v185_v18 = vrot.slane %v809_v3, %v826_v15  ;;  %v192_v19 = vrot.slane %v178_v12, %v826_v15 }
  0x41   : > { %v202_v20 = vrot.slane %v811_v5, %v826_v15  ;;  %v209_v21 = vrot.slane %v195_v13, %v826_v15  ;;  %v219_v22 = vrot.slane %v813_v6, %v826_v15  ;;  %v226_v23 = vrot.slane %v212_v14, %v826_v15 }
  0x42   : > { %v176_v24 = vcombine.high %v168_v16, %v168_v16  ;;  %v177_v25 = vcombine.high %v175_v17, %v175_v17  ;;  %v193_v26 = vcombine.high %v185_v18, %v185_v18  ;;  %v194_v27 = vcombine.high %v192_v19, %v192_v19 }
  0x43   : > { %v210_v28 = vcombine.high %v202_v20, %v202_v20  ;;  %v211_v29 = vcombine.high %v209_v21, %v209_v21  ;;  %v227_v30 = vcombine.high %v219_v22, %v219_v22  ;;  %v228_v31 = vcombine.high %v226_v23, %v226_v23 }
  0x44   : > { %v246_v32 = vsel %vm245_vm1, %v168_v16, -inf  ;;  %v247_v33 = vsel %vm245_vm1, %v176_v24, -inf  ;;  %v248_v34 = vsel %vm245_vm1, %v175_v17, -inf  ;;  %v249_v35 = vsel %vm245_vm1, %v177_v25, -inf }
  0x45   : > { %v250_v36 = vsel %vm245_vm1, %v185_v18, -inf  ;;  %v252_v37 = vsel %vm245_vm1, %v193_v26, -inf  ;;  %v254_v38 = vsel %vm245_vm1, %v192_v19, -inf  ;;  %v256_v39 = vsel %vm245_vm1, %v194_v27, -inf }
  0x46   : > { %v251_v40 = vmax.f32 %v246_v32, %v250_v36  ;;  %v253_v41 = vmax.f32 %v247_v33, %v252_v37  ;;  %v255_v42 = vmax.f32 %v248_v34, %v254_v38  ;;  %v257_v43 = vmax.f32 %v249_v35, %v256_v39 }
  0x47   : > { %v258_v44 = vsel %vm245_vm1, %v202_v20, -inf  ;;  %v260_v45 = vsel %vm245_vm1, %v210_v28, -inf  ;;  %v262_v46 = vsel %vm245_vm1, %v209_v21, -inf  ;;  %v264_v47 = vsel %vm245_vm1, %v211_v29, -inf }
  0x48   : > { %v259_v48 = vmax.f32 %v251_v40, %v258_v44  ;;  %v261_v49 = vmax.f32 %v253_v41, %v260_v45  ;;  %v263_v50 = vmax.f32 %v255_v42, %v262_v46  ;;  %v265_v51 = vmax.f32 %v257_v43, %v264_v47  ;;  %v868_v41 = vld [vmem:[%s937_s1] sm:$0x3] }
  0x49   : > { %v266_v52 = vsel %vm245_vm1, %v219_v22, -inf  ;;  %v268_v53 = vsel %vm245_vm1, %v227_v30, -inf  ;;  %v270_v54 = vsel %vm245_vm1, %v226_v23, -inf  ;;  %v272_v55 = vsel %vm245_vm1, %v228_v31, -inf }
  0x4a   : > { %v267_v56 = vmax.f32 %v259_v48, %v266_v52  ;;  %v269_v57 = vmax.f32 %v261_v49, %v268_v53  ;;  %v271_v58 = vmax.f32 %v263_v50, %v270_v54  ;;  %v273_v59 = vmax.f32 %v265_v51, %v272_v55 }
  0x4b   : > { %v285_v10 = vadd.s32 640, %v280_v63  ;;  %v287_v12 = vadd.s32 896, %v280_v63  ;;  %v288_v13 = vadd.s32 1024, %v280_v63  ;;  %v289_v14 = vadd.s32 1152, %v280_v63 }
  0x4c   : > { %v274_v60 = vmax.f32 %v267_v56, %v269_v57  ;;  %v275_v61 = vmax.f32 %v271_v58, %v273_v59  ;;  %v290_v16 = vadd.s32 1280, %v280_v63  ;;  %v291_v17 = vadd.s32 1408, %v280_v63 }
  0x4d   : > { %v292_v18 = vadd.s32 1536, %v280_v63  ;;  %v293_v19 = vadd.s32 1664, %v280_v63  ;;  %v294_v20 = vadd.s32 1792, %v280_v63  ;;  %v295_v21 = vadd.s32 1920, %v280_v63 }
  0x4e   : > { %v276_v62 = vmax.f32 %v274_v60, %v275_v61  ;;  %v695_v22 = vmov 269488144   ;;  %v309_v24 = vcombine.low %v280_v63, %v281_v0  ;;  %v310_v25 = vcombine.low %v282_v1, %v283_v7 }
  0x4f   : > { %v298_v23 = vunpack.c.l.s4 %v695_v22  ;;  %v326_v4 = vcombine.low %v284_v8, %v285_v10  ;;  %v327_v26 = vcombine.low %v286_v11, %v287_v12  ;;  %v343_v27 = vcombine.low %v288_v13, %v289_v14 }
  0x50   : > { %277 = vmax.xlane.f32.xlu0 %v276_v62  ;;  %v344_v28 = vcombine.low %v290_v16, %v291_v17  ;;  %v360_v29 = vcombine.low %v292_v18, %v293_v19  ;;  %v361_v30 = vcombine.low %v294_v20, %v295_v21  ;;  %v317_v32 = vrot.slane %v309_v24, %v826_v15 }
  0x51   : > { %v299_v31 = vunpack.c.0.s8 %v298_v23  ;;  %v324_v33 = vrot.slane %v310_v25, %v826_v15  ;;  %v334_v34 = vrot.slane %v326_v4, %v826_v15  ;;  %v341_v35 = vrot.slane %v327_v26, %v826_v15 }
  0x52   : > { %v351_v36 = vrot.slane %v343_v27, %v826_v15  ;;  %v358_v37 = vrot.slane %v344_v28, %v826_v15  ;;  %v368_v38 = vrot.slane %v360_v29, %v826_v15  ;;  %v375_v39 = vrot.slane %v361_v30, %v826_v15 }
  0x53   : > { %v302_v40 = vsub.s32 %v299_v31, %v815_v9  ;;  %v325_v42 = vcombine.low %v317_v32, %v324_v33  ;;  %v342_v43 = vcombine.low %v334_v34, %v341_v35 }
  0x54   : > { %v359_v44 = vcombine.low %v351_v36, %v358_v37  ;;  %v376_v45 = vcombine.low %v368_v38, %v375_v39 }
  0xdd   : > { %v870_v46 = vpop.xlane.xlu0 %277 }
  0xde   : > { %v303_v47 = vrot.slane %v870_v46, %v302_v40  ;;  %vm513_vm3 = vcmp.gt.f32.partialorder %v870_v46, %v868_v41 }
  0xdf   : > { %v514_v9 = vsel %vm513_vm3, %v870_v46, %v868_v41 }
  0xe0   : > { %vm305_vm4 = vcmp.eq.f32.partialorder %v807_v2, %v303_v47  ;;  %vm306_vm5 = vcmp.eq.f32.partialorder %v809_v3, %v303_v47  ;;  %vm307_vm6 = vcmp.eq.f32.partialorder %v811_v5, %v303_v47  ;;  %vm308_vm7 = vcmp.eq.f32.partialorder %v813_v6, %v303_v47  ;;  %516 = vst.msk [vmem:[%s937_s1] sm:$0x3] %vm515_vm2, %v514_v9 }
  0xe1   : > { %v377_v48 = vsel %vm305_vm4, %v325_v42, 2048  ;;  %v378_v49 = vsel %vm306_vm5, %v342_v43, 2048  ;;  %v379_v50 = vsel %vm307_vm6, %v359_v44, 2048  ;;  %v380_v51 = vsel %vm308_vm7, %v376_v45, 2048 }
  0xe2   : > { %v381_v52 = vcombine.high %v377_v48, %v377_v48  ;;  %v388_v53 = vrot.slane %v377_v48, %v826_v15  ;;  %v398_v54 = vcombine.high %v378_v49, %v378_v49  ;;  %v405_v2 = vrot.slane %v378_v49, %v826_v15 }
  0xe3   : > { %v415_v3 = vcombine.high %v379_v50, %v379_v50  ;;  %v422_v5 = vrot.slane %v379_v50, %v826_v15  ;;  %v432_v55 = vcombine.high %v380_v51, %v380_v51  ;;  %v439_v6 = vrot.slane %v380_v51, %v826_v15 }
  0xe4   : > { %v395_v56 = vrot.slane %v381_v52, %v826_v15  ;;  %v396_v57 = vcombine.high %v388_v53, %v388_v53  ;;  %v412_v58 = vrot.slane %v398_v54, %v826_v15  ;;  %v413_v59 = vcombine.high %v405_v2, %v405_v2 }
  0xe5   : > { %v429_v60 = vrot.slane %v415_v3, %v826_v15  ;;  %v430_v61 = vcombine.high %v422_v5, %v422_v5  ;;  %v446_v62 = vrot.slane %v432_v55, %v826_v15  ;;  %v447_v63 = vcombine.high %v439_v6, %v439_v6 }
  0xe6   : > { %v397_v0 = vcombine.high %v395_v56, %v395_v56  ;;  %v414_v1 = vcombine.high %v412_v58, %v412_v58  ;;  %v449_v7 = vsel %vm245_vm1, %v388_v53, 2147483647  ;;  %v450_v8 = vsel %vm245_vm1, %v396_v57, 2147483647  ;;  %v517_v53 = vld [vmem:[%s938_s2] sm:$0x3] }
  0xe7   : > { %v431_v10 = vcombine.high %v429_v60, %v429_v60  ;;  %v448_v11 = vcombine.high %v446_v62, %v446_v62  ;;  %v451_v12 = vsel %vm245_vm1, %v395_v56, 2147483647  ;;  %v453_v13 = vsel %vm245_vm1, %v405_v2, 2147483647 }
  0xe8   : > { %v452_v14 = vsel %vm245_vm1, %v397_v0, 2147483647  ;;  %vm454_vm8 = vcmp.lt.s32.totalorder %v449_v7, %v453_v13  ;;  %v456_v16 = vsel %vm245_vm1, %v413_v59, 2147483647  ;;  %v459_v15 = vsel %vm245_vm1, %v412_v58, 2147483647 }
  0xe9   : > { %v455_v17 = vsel %vm454_vm8, %v449_v7, %v453_v13  ;;  %vm457_vm9 = vcmp.lt.s32.totalorder %v450_v8, %v456_v16  ;;  %vm460_vm10 = vcmp.lt.s32.totalorder %v451_v12, %v459_v15  ;;  %v462_v18 = vsel %vm245_vm1, %v414_v1, 2147483647 }
  0xea   : > { %v458_v19 = vsel %vm457_vm9, %v450_v8, %v456_v16  ;;  %v461_v20 = vsel %vm460_vm10, %v451_v12, %v459_v15  ;;  %vm463_vm11 = vcmp.lt.s32.totalorder %v452_v14, %v462_v18  ;;  %v465_v21 = vsel %vm245_vm1, %v422_v5, 2147483647 }
  0xeb   : > { %v464_v22 = vsel %vm463_vm11, %v452_v14, %v462_v18  ;;  %vm466_vm12 = vcmp.lt.s32.totalorder %v455_v17, %v465_v21  ;;  %v468_v23 = vsel %vm245_vm1, %v430_v61, 2147483647  ;;  %v471_v24 = vsel %vm245_vm1, %v429_v60, 2147483647 }
  0xec   : > { %v467_v25 = vsel %vm466_vm12, %v455_v17, %v465_v21  ;;  %vm469_vm13 = vcmp.lt.s32.totalorder %v458_v19, %v468_v23  ;;  %vm472_vm14 = vcmp.lt.s32.totalorder %v461_v20, %v471_v24  ;;  %v474_v4 = vsel %vm245_vm1, %v431_v10, 2147483647 }
  0xed   : > { %v470_v26 = vsel %vm469_vm13, %v458_v19, %v468_v23  ;;  %v473_v27 = vsel %vm472_vm14, %v461_v20, %v471_v24  ;;  %vm475_vm15 = vcmp.lt.s32.totalorder %v464_v22, %v474_v4  ;;  %v477_v28 = vsel %vm245_vm1, %v439_v6, 2147483647 }
  0xee   : > { %v476_v29 = vsel %vm475_vm15, %v464_v22, %v474_v4  ;;  %vm478_vm0 = vcmp.lt.s32.totalorder %v467_v25, %v477_v28  ;;  %v480_v30 = vsel %vm245_vm1, %v447_v63, 2147483647  ;;  %v483_v31 = vsel %vm245_vm1, %v446_v62, 2147483647 }
  0xef   : > { %v479_v32 = vsel %vm478_vm0, %v467_v25, %v477_v28  ;;  %vm481_vm4 = vcmp.lt.s32.totalorder %v470_v26, %v480_v30  ;;  %vm484_vm5 = vcmp.lt.s32.totalorder %v473_v27, %v483_v31  ;;  %v486_v33 = vsel %vm245_vm1, %v448_v11, 2147483647 }
  0xf0   : > { %v482_v34 = vsel %vm481_vm4, %v470_v26, %v480_v30  ;;  %v485_v35 = vsel %vm484_vm5, %v473_v27, %v483_v31  ;;  %vm487_vm6 = vcmp.lt.s32.totalorder %v476_v29, %v486_v33  ;;  %v510_v51 = vstv %s574_s28 }
  0xf1   : > { %v488_v36 = vsel %vm487_vm6, %v476_v29, %v486_v33  ;;  %vm489_vm7 = vcmp.lt.s32.totalorder %v479_v32, %v482_v34 }
  0xf2   : > { %v490_v37 = vsel %vm489_vm7, %v479_v32, %v482_v34  ;;  %vm491_vm8 = vcmp.lt.s32.totalorder %v485_v35, %v488_v36 }
  0xf3   : > { %v492_v38 = vsel %vm491_vm8, %v485_v35, %v488_v36 }
  0xf4   : > { %vm493_vm9 = vcmp.lt.s32.totalorder %v490_v37, %v492_v38 }
  0xf5   : > { %v494_v39 = vsel %vm493_vm9, %v490_v37, %v492_v38 }
  0xf6   : > { %v496_v40 = vshra.s32 %v494_v39, 16  ;;  %v495_v43 = vand.u32 65535, %v494_v39 }
  0xf8   : > { %v498_v42 = vcvt.s32.f32 %v496_v40  ;;  %v497_v45 = vcvt.s32.f32 %v495_v43 }
  0xfa   : > { %499 = vmin.xlane.f32.xlu0 %v498_v42 }
 0x187   : > { %v500_v44 = vpop.xlane.xlu0 %499 }
 0x188   : > { %vm501_vm10 = vcmp.eq.f32.partialorder %v498_v42, %v500_v44  ;;  %v506_v9 = vcvt.f32.s32 %v500_v44 }
 0x189   : > { %v502_v47 = vsel %vm501_vm10, %v497_v45, inf }
 0x18a   : > { %503 = vmin.xlane.f32.xlu1 %v502_v47  ;;  %v507_v49 = vshll.u32 %v506_v9, 16 }
 0x217   : > { %v504_v48 = vpop.xlane.xlu1 %503 }
 0x218   : > { %v505_v50 = vcvt.f32.s32 %v504_v48 }
 0x21a   : > { %v508_v52 = vadd.s32 %v507_v49, %v505_v50 }
 0x21c   : > { %v511_v54 = vadd.s32 %v510_v51, %v508_v52 }
 0x21e   : > { %v518_v2 = vsel %vm513_vm3, %v511_v54, %v517_v53 }
 0x21f   : > { %519 = vst.msk [vmem:[%s938_s2] sm:$0x3] %vm515_vm2, %v518_v2 }
 0x220 PF: > { %p13_p7 = scmp.ge.s32.totalorder %s733_s14, 4   ;;  %s943_s9 = smov %s681_s10 }
 0x221   : > { %s944_s10 = smov %s685_s11  ;;  %s945_s11 = smov %s743_s17 }
 0x222   : > { %s946_s12 = smov %s733_s14  ;;  %15 = sbr.rel (!%p13_p7) target bundleno = 3 (0x3), region = 72 }
 0x229   :  { %537 = vsyncpa [#allocation3], 1 }
 0x22a   :  { %539 = vsyncpa [#allocation3 + $0x1], 1 }

</bundles_post_ra>
